<compile_context>
chip_gen: v7x
topology: tpu7x:2x2x1
jax: 0.10.0
libtpu: 0.0.40
codegen_flags: <defaults>
</compile_context>

<pallas_src>
import jax
import jax.numpy as jnp
from jax.experimental import pallas as pl
from jax.experimental.pallas import tpu as pltpu


def mlp_kernel(x_ref, w1_ref, b1_ref, w2_ref, b2_ref, w3_ref, b3_ref, o_ref):
    # hidden layer 1: sigmoid(x @ W1 + b1) -- f32 accumulation + f32 activation
    h1 = jnp.dot(x_ref[...], w1_ref[...], preferred_element_type=jnp.float32)
    h1 = jax.nn.sigmoid(h1 + b1_ref[...])
    # hidden layer 2: sigmoid(h1 @ W2 + b2)
    h2 = jnp.dot(h1.astype(w2_ref.dtype), w2_ref[...],
                 preferred_element_type=jnp.float32)
    h2 = jax.nn.sigmoid(h2 + b2_ref[...])
    # output layer: h2 @ W3 + b3 (no activation)
    out = jnp.dot(h2.astype(w3_ref.dtype), w3_ref[...],
                  preferred_element_type=jnp.float32)
    o_ref[...] = (out + b3_ref[...]).astype(o_ref.dtype)


def _round_up(x, m):
    return ((x + m - 1) // m) * m


def _choose_batch_tile(B, n_feature, H_pad, N_pad, act_itemsize,
                       vmem_budget=24 * 1024 * 1024, cap=1024):
    """Largest multiple-of-8 batch tile (<= cap) that fits the VMEM budget."""
    weight_bytes = (
        (n_feature * H_pad + H_pad * H_pad + H_pad * N_pad) * act_itemsize
        + (2 * H_pad + N_pad) * 4  # biases kept in f32
    )
    tb = min(cap, _round_up(B, 8))
    tb = _round_up(tb, 8)
    while tb > 8:
        # 2x double-buffered x/out tiles + f32 intermediates for one tile.
        act_bytes = 2 * tb * (n_feature + N_pad) * act_itemsize
        tmp_bytes = tb * (2 * H_pad + N_pad) * 4
        if weight_bytes + act_bytes + tmp_bytes <= vmem_budget:
            break
        tb //= 2
        tb = _round_up(tb, 8)
    return max(tb, 8), vmem_budget


def prepare_params(params, compute_dtype=jnp.float32):
    """One-time glue so the per-call forward pays no transpose / pad pass.

    Weights are transposed to [in, out] and zero-padded so that hidden/output
    widths are multiples of 128 (lane-aligned MXU operands, lane-dense output
    stores). Biases are lifted to [1, out_pad] rows (free sublane broadcast).
    Zero padding is exact: padded hidden activations (sigmoid(0)=0.5) only
    ever multiply zero weight rows, and padded output columns are sliced off.
    """
    w1, w2, w3 = params["w1"], params["w2"], params["w3"]
    b1, b2, b3 = params["b1"], params["b2"], params["b3"]
    n_hidden = int(w1.shape[0])
    n_output = int(w3.shape[0])
    n_feature = int(w1.shape[1])
    H = _round_up(n_hidden, 128)
    N = _round_up(n_output, 128)

    w1t = jnp.zeros((n_feature, H), compute_dtype)
    w1t = w1t.at[:, :n_hidden].set(w1.T.astype(compute_dtype))
    w2t = jnp.zeros((H, H), compute_dtype)
    w2t = w2t.at[:n_hidden, :n_hidden].set(w2.T.astype(compute_dtype))
    w3t = jnp.zeros((H, N), compute_dtype)
    w3t = w3t.at[:n_hidden, :n_output].set(w3.T.astype(compute_dtype))

    b1r = jnp.zeros((1, H), jnp.float32).at[0, :n_hidden].set(b1.astype(jnp.float32))
    b2r = jnp.zeros((1, H), jnp.float32).at[0, :n_hidden].set(b2.astype(jnp.float32))
    b3r = jnp.zeros((1, N), jnp.float32).at[0, :n_output].set(b3.astype(jnp.float32))

    return {
        "w1t": w1t, "w2t": w2t, "w3t": w3t,
        "b1r": b1r, "b2r": b2r, "b3r": b3r,
        "n_output": n_output,
        "compute_dtype": compute_dtype,
    }


def mlp_forward(x, prepared):
    """x: [B, n_feature]. prepared: output of prepare_params."""
    w1t, w2t, w3t = prepared["w1t"], prepared["w2t"], prepared["w3t"]
    b1r, b2r, b3r = prepared["b1r"], prepared["b2r"], prepared["b3r"]
    n_output = prepared["n_output"]
    compute_dtype = prepared["compute_dtype"]

    B, n_feature = x.shape
    H_pad = w1t.shape[1]
    N_pad = w3t.shape[1]
    out_dtype = x.dtype

    act_itemsize = jnp.dtype(compute_dtype).itemsize
    TB, vmem_budget = _choose_batch_tile(B, n_feature, H_pad, N_pad,
                                         act_itemsize)

    # Pad batch to a multiple of TB (TB is a multiple of 8 -> sublane aligned).
    B_pad = _round_up(B, TB)
    xp = x.astype(compute_dtype)
    if B_pad != B:
        xp = jnp.pad(xp, ((0, B_pad - B), (0, 0)))

    grid = (B_pad // TB,)

    cost = pl.CostEstimate(
        flops=int(2 * B_pad * (n_feature * H_pad + H_pad * H_pad + H_pad * N_pad)),
        transcendentals=int(2 * B_pad * H_pad),
        bytes_accessed=int(
            (B_pad * n_feature + B_pad * N_pad) * act_itemsize
            + (n_feature * H_pad + H_pad * H_pad + H_pad * N_pad) * act_itemsize
            + (2 * H_pad + N_pad) * 4),
    )

    out = pl.pallas_call(
        mlp_kernel,
        out_shape=jax.ShapeDtypeStruct((B_pad, N_pad), out_dtype),
        grid=grid,
        in_specs=[
            # streamed activation tiles
            pl.BlockSpec((TB, n_feature), lambda i: (i, 0)),
            # VMEM-resident weights / biases (same block every grid step)
            pl.BlockSpec((n_feature, H_pad), lambda i: (0, 0)),
            pl.BlockSpec((1, H_pad), lambda i: (0, 0)),
            pl.BlockSpec((H_pad, H_pad), lambda i: (0, 0)),
            pl.BlockSpec((1, H_pad), lambda i: (0, 0)),
            pl.BlockSpec((H_pad, N_pad), lambda i: (0, 0)),
            pl.BlockSpec((1, N_pad), lambda i: (0, 0)),
        ],
        out_specs=pl.BlockSpec((TB, N_pad), lambda i: (i, 0)),
        compiler_params=pltpu.CompilerParams(
            dimension_semantics=("parallel",),
            vmem_limit_bytes=vmem_budget,
        ),
        cost_estimate=cost,
    )(xp, w1t, b1r, w2t, b2r, w3t, b3r)

    # Slice off batch pad and output-feature pad (layout plumbing, outside kernel).
    if B_pad != B:
        out = out[:B]
    if N_pad != n_output:
        out = out[:, :n_output]
    return out


def init_params(key, n_feature, n_hidden, n_output):
    """Deterministic init mimicking torch.nn.Linear's U(-1/sqrt(fan_in), 1/sqrt(fan_in))."""
    ks = jax.random.split(key, 6)

    def lin(kw, kb, fan_in, fan_out):
        bound = 1.0 / jnp.sqrt(fan_in)
        w = jax.random.uniform(kw, (fan_out, fan_in), jnp.float32, -bound, bound)
        b = jax.random.uniform(kb, (fan_out,), jnp.float32, -bound, bound)
        return w, b

    w1, b1 = lin(ks[0], ks[1], n_feature, n_hidden)
    w2, b2 = lin(ks[2], ks[3], n_hidden, n_hidden)
    w3, b3 = lin(ks[4], ks[5], n_hidden, n_output)
    return {"w1": w1, "b1": b1, "w2": w2, "b2": b2, "w3": w3, "b3": b3}


def reference_forward(x, p):
    h1 = jax.nn.sigmoid(x @ p["w1"].T + p["b1"])
    h2 = jax.nn.sigmoid(h1 @ p["w2"].T + p["b2"])
    return h2 @ p["w3"].T + p["b3"]


if __name__ == "__main__":
    key = jax.random.PRNGKey(0)
    k_x, k_p, k_x2 = jax.random.split(key, 3)

    batch, n_feature, n_hidden, n_output = 8, 16, 32, 4
    x = jax.random.normal(k_x, (batch, n_feature), jnp.float32)
    params = init_params(k_p, n_feature, n_hidden, n_output)
    prepared = prepare_params(params, compute_dtype=jnp.float32)

    out = mlp_forward(x, prepared)
    out = jax.block_until_ready(out)
    ref = reference_forward(x, params)
    assert out.shape == (batch, n_output)
    assert jnp.allclose(out, ref, atol=1e-5, rtol=1e-5)

    # Also exercise the batch-padded path (non-multiple-of-8 batch).
    x2 = jax.random.normal(k_x2, (20, n_feature), jnp.float32)
    out2 = jax.block_until_ready(mlp_forward(x2, prepared))
    ref2 = reference_forward(x2, params)
    assert out2.shape == (20, n_output)
    assert jnp.allclose(out2, ref2, atol=1e-5, rtol=1e-5)

    print("KERNEL_OK")
</pallas_src>

<mosaic_0001>
module attributes {stable_mosaic.version = 11 : i64} {
  func.func @mlp_kernel(%arg0: i32, %arg1: memref<8x16xf32, #tpu.memory_space<vmem>>, %arg2: memref<16x128xf32, #tpu.memory_space<vmem>>, %arg3: memref<1x128xf32, #tpu.memory_space<vmem>>, %arg4: memref<128x128xf32, #tpu.memory_space<vmem>>, %arg5: memref<1x128xf32, #tpu.memory_space<vmem>>, %arg6: memref<128x128xf32, #tpu.memory_space<vmem>>, %arg7: memref<1x128xf32, #tpu.memory_space<vmem>>, %arg8: memref<8x128xf32, #tpu.memory_space<vmem>>) attributes {dimension_semantics = [#tpu.dimension_semantics<parallel>], iteration_bounds = array<i64: 1>, scalar_prefetch = 0 : i64, scratch_operands = 0 : i64, tpu.core_type = #tpu.core_type<tc>, window_params = [{transform_indices = @transform_0, window_bounds = array<i64: 8, 16>}, {pipeline_mode = #tpu.pipeline_mode<synchronous>, transform_indices = @transform_1, window_bounds = array<i64: 16, 128>}, {pipeline_mode = #tpu.pipeline_mode<synchronous>, transform_indices = @transform_2, window_bounds = array<i64: 1, 128>}, {pipeline_mode = #tpu.pipeline_mode<synchronous>, transform_indices = @transform_3, window_bounds = array<i64: 128, 128>}, {pipeline_mode = #tpu.pipeline_mode<synchronous>, transform_indices = @transform_4, window_bounds = array<i64: 1, 128>}, {pipeline_mode = #tpu.pipeline_mode<synchronous>, transform_indices = @transform_5, window_bounds = array<i64: 128, 128>}, {pipeline_mode = #tpu.pipeline_mode<synchronous>, transform_indices = @transform_6, window_bounds = array<i64: 1, 128>}, {transform_indices = @transform_7, window_bounds = array<i64: 8, 128>}]} {
    %c0 = arith.constant 0 : index
    %c0_0 = arith.constant 0 : index
    %0 = vector.load %arg1[%c0, %c0_0] : memref<8x16xf32, #tpu.memory_space<vmem>>, vector<8x16xf32>
    %c0_1 = arith.constant 0 : index
    %c0_2 = arith.constant 0 : index
    %1 = vector.load %arg2[%c0_1, %c0_2] : memref<16x128xf32, #tpu.memory_space<vmem>>, vector<16x128xf32>
    %cst = arith.constant dense<0.000000e+00> : vector<8x128xf32>
    %2 = tpu.matmul %0, %1, %cst {dimension_numbers = #tpu.dot_dimension_numbers<[1], [0], [0], [1], [0, 0, 1, 1], [], []>} : vector<8x16xf32>, vector<16x128xf32>, vector<8x128xf32> -> vector<8x128xf32>
    %c0_3 = arith.constant 0 : index
    %c0_4 = arith.constant 0 : index
    %3 = vector.load %arg3[%c0_3, %c0_4] : memref<1x128xf32, #tpu.memory_space<vmem>>, vector<1x128xf32>
    %4 = vector.broadcast %3 : vector<1x128xf32> to vector<8x128xf32>
    %5 = arith.addf %2, %4 : vector<8x128xf32>
    %6 = arith.negf %5 : vector<8x128xf32>
    %7 = math.exp %6 : vector<8x128xf32>
    %cst_5 = arith.constant 1.000000e+00 : f32
    %8 = vector.broadcast %cst_5 : f32 to vector<8x128xf32>
    %9 = arith.addf %8, %7 : vector<8x128xf32>
    %10 = arith.divf %8, %9 : vector<8x128xf32>
    %c0_6 = arith.constant 0 : index
    %c0_7 = arith.constant 0 : index
    %11 = vector.load %arg4[%c0_6, %c0_7] : memref<128x128xf32, #tpu.memory_space<vmem>>, vector<128x128xf32>
    %cst_8 = arith.constant dense<0.000000e+00> : vector<8x128xf32>
    %12 = tpu.matmul %10, %11, %cst_8 {dimension_numbers = #tpu.dot_dimension_numbers<[1], [0], [0], [1], [0, 0, 1, 1], [], []>} : vector<8x128xf32>, vector<128x128xf32>, vector<8x128xf32> -> vector<8x128xf32>
    %c0_9 = arith.constant 0 : index
    %c0_10 = arith.constant 0 : index
    %13 = vector.load %arg5[%c0_9, %c0_10] : memref<1x128xf32, #tpu.memory_space<vmem>>, vector<1x128xf32>
    %14 = vector.broadcast %13 : vector<1x128xf32> to vector<8x128xf32>
    %15 = arith.addf %12, %14 : vector<8x128xf32>
    %16 = arith.negf %15 : vector<8x128xf32>
    %17 = math.exp %16 : vector<8x128xf32>
    %cst_11 = arith.constant 1.000000e+00 : f32
    %18 = vector.broadcast %cst_11 : f32 to vector<8x128xf32>
    %19 = arith.addf %18, %17 : vector<8x128xf32>
    %20 = arith.divf %18, %19 : vector<8x128xf32>
    %c0_12 = arith.constant 0 : index
    %c0_13 = arith.constant 0 : index
    %21 = vector.load %arg6[%c0_12, %c0_13] : memref<128x128xf32, #tpu.memory_space<vmem>>, vector<128x128xf32>
    %cst_14 = arith.constant dense<0.000000e+00> : vector<8x128xf32>
    %22 = tpu.matmul %20, %21, %cst_14 {dimension_numbers = #tpu.dot_dimension_numbers<[1], [0], [0], [1], [0, 0, 1, 1], [], []>} : vector<8x128xf32>, vector<128x128xf32>, vector<8x128xf32> -> vector<8x128xf32>
    %c0_15 = arith.constant 0 : index
    %c0_16 = arith.constant 0 : index
    %23 = vector.load %arg7[%c0_15, %c0_16] : memref<1x128xf32, #tpu.memory_space<vmem>>, vector<1x128xf32>
    %24 = vector.broadcast %23 : vector<1x128xf32> to vector<8x128xf32>
    %25 = arith.addf %22, %24 : vector<8x128xf32>
    %c0_17 = arith.constant 0 : index
    %c0_18 = arith.constant 0 : index
    %26 = vector.load %arg8[%c0_17, %c0_18] : memref<8x128xf32, #tpu.memory_space<vmem>>, vector<8x128xf32>
    tpu.vector_store %arg8[%c0_17, %c0_18], %25 {strides = array<i32>} : memref<8x128xf32, #tpu.memory_space<vmem>>, vector<8x128xf32>,
    return
  }
  func.func @transform_0(%arg0: i32) -> (i32, i32) {
    %c0_i32 = arith.constant 0 : i32
    %c0_i32_0 = arith.constant 0 : i32
    return %arg0, %c0_i32 : i32, i32
  }
  func.func @transform_1(%arg0: i32) -> (i32, i32) {
    %c0_i32 = arith.constant 0 : i32
    %c0_i32_0 = arith.constant 0 : i32
    %c0_i32_1 = arith.constant 0 : i32
    return %c0_i32, %c0_i32_0 : i32, i32
  }
  func.func @transform_2(%arg0: i32) -> (i32, i32) {
    %c0_i32 = arith.constant 0 : i32
    %c0_i32_0 = arith.constant 0 : i32
    %c0_i32_1 = arith.constant 0 : i32
    return %c0_i32, %c0_i32_0 : i32, i32
  }
  func.func @transform_3(%arg0: i32) -> (i32, i32) {
    %c0_i32 = arith.constant 0 : i32
    %c0_i32_0 = arith.constant 0 : i32
    %c0_i32_1 = arith.constant 0 : i32
    return %c0_i32, %c0_i32_0 : i32, i32
  }
  func.func @transform_4(%arg0: i32) -> (i32, i32) {
    %c0_i32 = arith.constant 0 : i32
    %c0_i32_0 = arith.constant 0 : i32
    %c0_i32_1 = arith.constant 0 : i32
    return %c0_i32, %c0_i32_0 : i32, i32
  }
  func.func @transform_5(%arg0: i32) -> (i32, i32) {
    %c0_i32 = arith.constant 0 : i32
    %c0_i32_0 = arith.constant 0 : i32
    %c0_i32_1 = arith.constant 0 : i32
    return %c0_i32, %c0_i32_0 : i32, i32
  }
  func.func @transform_6(%arg0: i32) -> (i32, i32) {
    %c0_i32 = arith.constant 0 : i32
    %c0_i32_0 = arith.constant 0 : i32
    %c0_i32_1 = arith.constant 0 : i32
    return %c0_i32, %c0_i32_0 : i32, i32
  }
  func.func @transform_7(%arg0: i32) -> (i32, i32) {
    %c0_i32 = arith.constant 0 : i32
    %c0_i32_0 = arith.constant 0 : i32
    return %arg0, %c0_i32 : i32, i32
  }
}

</mosaic_0001>

<bundles_post_ra>
// kernel: tpu_custom_call.1
= control target key start
LH: loop header
LB: loop body
LE: loop exit
PB: predicated region body
PF: predicated region fallthrough
CT: control target
= control target key end

     0   :  { %12 = vsyncpa [#allocation3], 0  ;;  %s835_s0 = inlined_call_operand.hbm [shape: f32[8,16], index: 0, kind: input, shape index: {}]   ;;  %s836_s1 = inlined_call_operand.hbm [shape: f32[16,128], index: 1, kind: input, shape index: {}]   ;;  %s837_s2 = inlined_call_operand.vmem [shape: f32[1,128], index: 2, kind: input, shape index: {}]   ;;  %s838_s3 = inlined_call_operand.hbm [shape: f32[128,128], index: 3, kind: input, shape index: {}]   ;;  %s839_s4 = inlined_call_operand.vmem [shape: f32[1,128], index: 4, kind: input, shape index: {}]   ;;  %s840_s5 = inlined_call_operand.hbm [shape: f32[128,128], index: 5, kind: input, shape index: {}]   ;;  %s841_s6 = inlined_call_operand.vmem [shape: f32[1,128], index: 6, kind: input, shape index: {}]   ;;  %s842_s7 = inlined_call_operand.hbm [shape: f32[8,128], index: 7, kind: output, shape index: {}]  }
   0x1   :  { %13 = vsyncpa [#allocation6], 0 }
   0x2   :  { %14 = vsyncpa [#allocation9], 0 }
   0x3   :  { %15 = vsyncpa [#allocation4], 0  ;;  %s687_s24 = smov [#allocation5]   ;;  %s569_s28 = scalar_lea.hbm %s836_s1, 256 }
   0x4   :  { %s31_s25 = sshll.u32 %s687_s24, 4  ;;  %p570_p0 = scmp.ne.s32.totalorder %s836_s1, %s569_s28  ;;  %s32_s25 = int_to_ptr.vmem [resolvable:$true] %s31_s25 }
   0x5   :  { %p573_p1 = scmp.lt.u32.totalorder %s569_s28, %s836_s1 }
   0x7   :  { %p575_p2 = pnand %p573_p1, %p570_p0 }
   0x9   :  { %578 = shalt.err (!%p575_p2)
}
   0xa   :  { %s579_s10 = scalar_lea.vmem %s32_s25, 256  ;;  %p584_p4 = scmp.lt.s32.totalorder %s32_s25, %s32_s25 }
   0xb   :  { %p580_p3 = scmp.ne.s32.totalorder %s32_s25, %s579_s10  ;;  %p585_p5 = scmp.lt.s32.totalorder %s579_s10, %s579_s10 }
   0xd   :  { %p586_p6 = por %p585_p5, %p584_p4 }
   0xf   :  { %p587_p7 = pnand %p586_p6, %p580_p3 }
  0x11   :  { %590 = shalt.err (!%p587_p7)
}
  0x12   :  { %s688_s11 = smov 128   ;;  %s689_s12 = smov 8  }
  0x13   :  { %37 = dma.hbm_to_vmem [thread:$0]  %s836_s1, 256, %s32_s25, [#allocation6], %s688_s11, %s688_s11, %s689_s12  }
  0x14   :  { %s690_s15 = smov [#allocation2]   ;;  %s691_s17 = smov [#allocation7]  }
  0x15   :  { %s22_s16 = sshll.u32 %s690_s15, 4  ;;  %s45_s18 = sshll.u32 %s691_s17, 4  ;;  %s23_s16 = int_to_ptr.vmem [resolvable:$true] %s22_s16  ;;  %s46_s18 = int_to_ptr.vmem [resolvable:$true] %s45_s18 }
  0x16   :  { %s591_s21 = scalar_lea.hbm %s835_s0, 128 }
  0x17   :  { %p592_p8 = scmp.ne.s32.totalorder %s835_s0, %s591_s21  ;;  %p595_p9 = scmp.lt.u32.totalorder %s591_s21, %s835_s0 }
  0x19   :  { %p597_p10 = pnand %p595_p9, %p592_p8 }
  0x1b   :  { %600 = shalt.err (!%p597_p10)
}
  0x1c   :  { %s601_s1 = scalar_lea.vmem %s23_s16, 128  ;;  %p606_p12 = scmp.lt.s32.totalorder %s23_s16, %s23_s16 }
  0x1d   :  { %p602_p11 = scmp.ne.s32.totalorder %s23_s16, %s601_s1  ;;  %p607_p13 = scmp.lt.s32.totalorder %s601_s1, %s601_s1 }
  0x1f   :  { %p608_p0 = por %p607_p13, %p606_p12 }
  0x21   :  { %p609_p1 = pnand %p608_p0, %p602_p11 }
  0x23   :  { %612 = shalt.err (!%p609_p1)
}
  0x24   :  { %25 = dma.hbm_to_vmem [thread:$0]  %s835_s0, 128, %s23_s16, [#allocation3]  }
  0x25   :  { %s613_s30 = scalar_lea.hbm %s838_s3, 2048 }
  0x26   :  { %p614_p2 = scmp.ne.s32.totalorder %s838_s3, %s613_s30  ;;  %p617_p3 = scmp.lt.u32.totalorder %s613_s30, %s838_s3 }
  0x28   :  { %p619_p4 = pnand %p617_p3, %p614_p2 }
  0x2a   :  { %622 = shalt.err (!%p619_p4)
}
  0x2b   :  { %s623_s14 = scalar_lea.vmem %s46_s18, 2048  ;;  %p628_p6 = scmp.lt.s32.totalorder %s46_s18, %s46_s18 }
  0x2c   :  { %p624_p5 = scmp.ne.s32.totalorder %s46_s18, %s623_s14  ;;  %p629_p7 = scmp.lt.s32.totalorder %s623_s14, %s623_s14 }
  0x2e   :  { %p630_p8 = por %p629_p7, %p628_p6 }
  0x30   :  { %p631_p9 = pnand %p630_p8, %p624_p5 }
  0x32   :  { %634 = shalt.err (!%p631_p9)
}
  0x33   :  { %51 = dma.hbm_to_vmem [thread:$0]  %s838_s3, 2048, %s46_s18, [#allocation6], %s688_s11, %s688_s11, %s689_s12  }
  0x34   :  { %s692_s16 = smov [#allocation8]   ;;  %s635_s21 = scalar_lea.hbm %s840_s5, 2048 }
  0x35   :  { %s59_s17 = sshll.u32 %s692_s16, 4  ;;  %p636_p10 = scmp.ne.s32.totalorder %s840_s5, %s635_s21  ;;  %s60_s17 = int_to_ptr.vmem [resolvable:$true] %s59_s17 }
  0x36   :  { %p639_p11 = scmp.lt.u32.totalorder %s635_s21, %s840_s5 }
  0x38   :  { %p641_p12 = pnand %p639_p11, %p636_p10 }
  0x3a   :  { %644 = shalt.err (!%p641_p12)
}
  0x3b   :  { %s645_s1 = scalar_lea.vmem %s60_s17, 2048  ;;  %p650_p0 = scmp.lt.s32.totalorder %s60_s17, %s60_s17 }
  0x3c   :  { %p646_p13 = scmp.ne.s32.totalorder %s60_s17, %s645_s1  ;;  %p651_p1 = scmp.lt.s32.totalorder %s645_s1, %s645_s1 }
  0x3e   :  { %p652_p2 = por %p651_p1, %p650_p0 }
  0x40   :  { %p653_p3 = pnand %p652_p2, %p646_p13 }
  0x42   :  { %656 = shalt.err (!%p653_p3)
}
  0x43   :  { %65 = dma.hbm_to_vmem [thread:$0]  %s840_s5, 2048, %s60_s17, [#allocation9], %s688_s11, %s688_s11, %s689_s12  }
  0x44   :  { %679 = dma.done.wait [#allocation3], 128  }
  0x45   :  { %680 = vsyncadd [#allocation3], 4294967168 }
  0x46   :  { %681 = dma.done.wait [#allocation6], 2304  }
  0x47   :  { %682 = vsyncadd [#allocation6], 4294964992 }
  0x48   :  { %683 = dma.done.wait [#allocation9], 2048  }
  0x49   :  { %684 = vsyncadd [#allocation9], 4294965248  ;;  %v693_v0 = vmov 0.0|0.0   ;;  %vm694_vm0 = vmmov 0   ;;  %v695_v1 = vmov 0.0   ;;  %v81_v2 = vld [vmem:[#allocation5] sm:$0xff] }
  0x4a   :  { %500 = vmatprep.subr.bf16.mxu0 %v693_v0  ;;  %427 = vmatprep.mubr.msk.f32.mxu0 %vm694_vm0, %v695_v1  ;;  %v82_v3 = vld [vmem:[#allocation5 + $0x8] sm:$0xff]  ;;  %v170_v5 = vld [vmem:[#allocation7] sm:$0xff]  ;;  %v171_v6 = vld [vmem:[#allocation7 + $0x8] sm:$0xff]  ;;  %vm90_vm1 = vcmask 130048   ;;  %s696_s28 = smov [#allocation10]  }
  0x4b   :  { %503 = vmatprep.subr.bf16.mxu1 %v693_v0  ;;  %462 = vmatprep.mubr.msk.f32.mxu1 %vm694_vm0, %v695_v1  ;;  %v501_v4 = vpack.c.bf16 %v82_v3, %v81_v2  ;;  %v504_v7 = vpack.c.bf16 %v171_v6, %v170_v5  ;;  %v80_v8 = vld [vmem:[#allocation2] sm:$0xff]  ;;  %v172_v9 = vld [vmem:[#allocation7 + $0x10] sm:$0xff]  ;;  %v173_v10 = vld [vmem:[#allocation7 + $0x18] sm:$0xff]  ;;  %s369_s29 = sshll.u32 %s696_s28, 4  ;;  %s370_s29 = int_to_ptr.vmem [resolvable:$true] %s369_s29 }
  0x4c   :  { %v507_v11 = vpack.c.bf16 %v173_v10, %v172_v9  ;;  %v174_v12 = vld [vmem:[#allocation7 + $0x20] sm:$0xff]  ;;  %v175_v13 = vld [vmem:[#allocation7 + $0x28] sm:$0xff]  ;;  %v176_v15 = vld [vmem:[#allocation7 + $0x30] sm:$0xff]  ;;  %p662_p5 = scmp.lt.s32.totalorder %s370_s29, %s370_s29 }
  0x4d   :  { %502 = vmatpush3.bf16.msra.mxu0 %v501_v4  ;;  %505 = vmatpush3.bf16.msra.mxu1 %v504_v7  ;;  %v510_v14 = vpack.c.bf16 %v175_v13, %v174_v12  ;;  %v177_v16 = vld [vmem:[#allocation7 + $0x38] sm:$0xff]  ;;  %v178_v18 = vld [vmem:[#allocation7 + $0x40] sm:$0xff]  ;;  %v179_v19 = vld [vmem:[#allocation7 + $0x48] sm:$0xff] }
  0x4e   :  { %527 = vmatprep.subr.bf16.mxu0 %v693_v0  ;;  %506 = vmatprep.subr.bf16.mxu1 %v693_v0  ;;  %v513_v17 = vpack.c.bf16 %v177_v16, %v176_v15  ;;  %v516_v20 = vpack.c.bf16 %v179_v19, %v178_v18  ;;  %v180_v21 = vld [vmem:[#allocation7 + $0x50] sm:$0xff]  ;;  %v181_v22 = vld [vmem:[#allocation7 + $0x58] sm:$0xff]  ;;  %v182_v24 = vld [vmem:[#allocation7 + $0x60] sm:$0xff] }
  0x4f   :  { %v519_v23 = vpack.c.bf16 %v181_v22, %v180_v21  ;;  %v183_v25 = vld [vmem:[#allocation7 + $0x68] sm:$0xff]  ;;  %v184_v27 = vld [vmem:[#allocation7 + $0x70] sm:$0xff]  ;;  %v185_v28 = vld [vmem:[#allocation7 + $0x78] sm:$0xff] }
  0x50   :  { %428 = vmatmul.mubr.msk.f32.vlgmr.msra.gmra.mrb[0].mxu0 %vm90_vm1, %v80_v8  ;;  %v522_v26 = vpack.c.bf16 %v183_v25, %v182_v24  ;;  %v525_v29 = vpack.c.bf16 %v185_v28, %v184_v27  ;;  %v269_v30 = vld [vmem:[#allocation8] sm:$0xff]  ;;  %v270_v31 = vld [vmem:[#allocation8 + $0x8] sm:$0xff]  ;;  %v271_v41 = vld [vmem:[#allocation8 + $0x10] sm:$0xff] }
  0x51   :  { %497 = vmatprep.mubr.msk.f32.mxu0 %vm694_vm0, %v695_v1  ;;  %508 = vmatpush3.bf16.msra.mxu1 %v507_v11  ;;  %v528_v32 = vpack.c.bf16 %v270_v31, %v269_v30  ;;  %v380_v33 = vld [vmem:[%s837_s2] ss:$0 sm:$0xff]  ;;  %v272_v42 = vld [vmem:[#allocation8 + $0x18] sm:$0xff]  ;;  %v273_v44 = vld [vmem:[#allocation8 + $0x20] sm:$0xff] }
  0x52   :  { %509 = vmatprep.subr.bf16.mxu1 %v693_v0  ;;  %v531_v43 = vpack.c.bf16 %v272_v42, %v271_v41  ;;  %v274_v45 = vld [vmem:[#allocation8 + $0x28] sm:$0xff]  ;;  %v275_v47 = vld [vmem:[#allocation8 + $0x30] sm:$0xff]  ;;  %v276_v48 = vld [vmem:[#allocation8 + $0x38] sm:$0xff] }
  0x53   :  { %529 = vmatpush3.bf16.msra.mxu0 %v528_v32  ;;  %v534_v46 = vpack.c.bf16 %v274_v45, %v273_v44  ;;  %v537_v49 = vpack.c.bf16 %v276_v48, %v275_v47  ;;  %v277_v50 = vld [vmem:[#allocation8 + $0x40] sm:$0xff]  ;;  %v278_v51 = vld [vmem:[#allocation8 + $0x48] sm:$0xff]  ;;  %v279_v53 = vld [vmem:[#allocation8 + $0x50] sm:$0xff] }
  0x54   :  { %530 = vmatprep.subr.bf16.mxu0 %v693_v0  ;;  %v540_v52 = vpack.c.bf16 %v278_v51, %v277_v50  ;;  %v280_v54 = vld [vmem:[#allocation8 + $0x58] sm:$0xff]  ;;  %v281_v56 = vld [vmem:[#allocation8 + $0x60] sm:$0xff]  ;;  %v282_v57 = vld [vmem:[#allocation8 + $0x68] sm:$0xff] }
  0x55   :  { %511 = vmatpush3.bf16.msra.mxu1 %v510_v14  ;;  %v543_v55 = vpack.c.bf16 %v280_v54, %v279_v53  ;;  %v546_v58 = vpack.c.bf16 %v282_v57, %v281_v56  ;;  %v283_v59 = vld [vmem:[#allocation8 + $0x70] sm:$0xff]  ;;  %v284_v60 = vld [vmem:[#allocation8 + $0x78] sm:$0xff]  ;;  %v383_v62 = vld [vmem:[%s839_s4] ss:$0 sm:$0xff]  ;;  %s657_s4 = scalar_lea.vmem %s370_s29, 128 }
  0x56   :  { %512 = vmatprep.subr.bf16.mxu1 %v693_v0  ;;  %v549_v61 = vpack.c.bf16 %v284_v60, %v283_v59  ;;  %v385_v7 = vld [vmem:[%s841_s6] ss:$0 sm:$0xff]  ;;  %p658_p4 = scmp.ne.s32.totalorder %s370_s29, %s657_s4  ;;  %p663_p6 = scmp.lt.s32.totalorder %s657_s4, %s657_s4 }
  0x57   :  { %532 = vmatpush3.bf16.msra.mxu0 %v531_v43 }
  0x58   :  { %533 = vmatprep.subr.bf16.mxu0 %v693_v0  ;;  %p664_p7 = por %p663_p6, %p662_p5 }
  0x59   :  { %514 = vmatpush3.bf16.msra.mxu1 %v513_v17 }
  0x5a   :  { %515 = vmatprep.subr.bf16.mxu1 %v693_v0  ;;  %p665_p8 = pnand %p664_p7, %p658_p4 }
  0x5b   :  { %535 = vmatpush3.bf16.msra.mxu0 %v534_v46 }
  0x5c   :  { %536 = vmatprep.subr.bf16.mxu0 %v693_v0 }
  0x5d   :  { %517 = vmatpush3.bf16.msra.mxu1 %v516_v20 }
  0x5e   :  { %518 = vmatprep.subr.bf16.mxu1 %v693_v0 }
  0x5f   :  { %538 = vmatpush3.bf16.msra.mxu0 %v537_v49 }
  0x60   :  { %539 = vmatprep.subr.bf16.mxu0 %v693_v0 }
  0x61   :  { %520 = vmatpush3.bf16.msra.mxu1 %v519_v23 }
  0x62   :  { %521 = vmatprep.subr.bf16.mxu1 %v693_v0 }
  0x63   :  { %541 = vmatpush3.bf16.msra.mxu0 %v540_v52 }
  0x64   :  { %542 = vmatprep.subr.bf16.mxu0 %v693_v0 }
  0x65   :  { %523 = vmatpush3.bf16.msra.mxu1 %v522_v26 }
  0x66   :  { %524 = vmatprep.subr.bf16.mxu1 %v693_v0 }
  0x67   :  { %544 = vmatpush3.bf16.msra.mxu0 %v543_v55 }
  0x68   :  { %545 = vmatprep.subr.bf16.mxu0 %v693_v0 }
  0x69   :  { %526 = vmatpush3.bf16.msra.mxu1 %v525_v29 }
  0x6b   :  { %547 = vmatpush3.bf16.msra.mxu0 %v546_v58 }
  0x6c   :  { %548 = vmatprep.subr.bf16.mxu0 %v693_v0 }
  0x6f   :  { %550 = vmatpush3.bf16.msra.mxu0 %v549_v61 }
 0x123   :  { %v160_v34 = vpop.f32.mrb[0].mxu0 }
 0x124   :  { %v161_v35 = vadd.f32 %v380_v33, %v160_v34  ;;  %v429_v36 = vpop.f32.mrb[1].mxu0 }
 0x126   :  { %v382_v37 = vmul.f32 -1.442695, %v161_v35 }
 0x128   :  { %561 = vpow2.f32 %v382_v37 }
 0x132   :  { %v562_v38 = vpop.eup %561 }
 0x133   :  { %v167_v39 = vadd.f32 1.0, %v562_v38 }
 0x135   :  { %563 = vrcp.f32 %v167_v39 }
 0x13f   :  { %v564_v40 = vpop.eup %563 }
 0x140   :  { %463 = vmatmul.mubr.f32.vlgmr.msra.gmra.mrb[0].mxu1 %v564_v40 }
 0x213   :  { %v259_v63 = vpop.f32.mrb[0].mxu1 }
 0x214   :  { %v260_v1 = vadd.f32 %v383_v62, %v259_v63  ;;  %v464_v2 = vpop.f32.mrb[1].mxu1 }
 0x216   :  { %v384_v3 = vmul.f32 -1.442695, %v260_v1 }
 0x218   :  { %565 = vpow2.f32 %v384_v3 }
 0x222   :  { %v566_v4 = vpop.eup %565 }
 0x223   :  { %v266_v5 = vadd.f32 1.0, %v566_v4 }
 0x225   :  { %567 = vrcp.f32 %v266_v5 }
 0x22f   :  { %v568_v6 = vpop.eup %567 }
 0x230   :  { %498 = vmatmul.mubr.f32.vlgmr.msra.gmra.mrb[2].mxu0 %v568_v6 }
 0x303   :  { %v358_v0 = vpop.f32.mrb[2].mxu0 }
 0x304   :  { %v359_v8 = vadd.f32 %v385_v7, %v358_v0  ;;  %v499_v9 = vpop.f32.mrb[3].mxu0 }
 0x306   :  { %362 = vst [vmem:[#allocation10] sm:$0xff] %v359_v8 }
 0x307   :  { %668 = shalt.err (!%p665_p8)
}
 0x308   :  { %s669_s9 = scalar_lea.hbm %s842_s7, 128 }
 0x309   :  { %p670_p9 = scmp.ne.s32.totalorder %s842_s7, %s669_s9  ;;  %p673_p10 = scmp.lt.u32.totalorder %s669_s9, %s842_s7 }
 0x30b   :  { %p675_p11 = pnand %p673_p10, %p670_p9 }
 0x30d   :  { %678 = shalt.err (!%p675_p11)
}
 0x30e   :  { %372 = dma.vmem_to_hbm [thread:$0]  %s370_s29, 128, %s842_s7, [#allocation4]  }
 0x30f   :  { %685 = dma.done.wait [#allocation4], 128  }
 0x310   :  { %686 = vsyncadd [#allocation4], 4294967168 }
 0x311   :  { %376 = vsyncpa [#allocation3], 1 }
 0x312   :  { %377 = vsyncpa [#allocation6], 1 }
 0x313   :  { %378 = vsyncpa [#allocation9], 1 }
 0x314   :  { %379 = vsyncpa [#allocation4], 1 }

</bundles_post_ra>
